<compile_context>
chip_gen: v7x
topology: tpu7x:2x2x1
jax: 0.10.0
libtpu: 0.0.40
codegen_flags: <defaults>
</compile_context>

<pallas_src>
import functools

import jax
import jax.numpy as jnp
from jax.experimental import pallas as pl
from jax.experimental.pallas import tpu as pltpu


# ---------------------------------------------------------------------------
# Fused kernel: projections + pooled phi/g + attention + output conv + residual
# ---------------------------------------------------------------------------
def _attn_block_kernel(x_cs_ref, x_dec_ref, wt_ref, w_gp_ref, wo_ref, out_ref, *, c2):
    # Per grid step (one batch element, one query tile):
    #   x_cs  : (1, C, TQ)      channels-first f32 (residual + theta source)
    #   x_dec : (1, 4, C, S4)   four 2x-decimated sub-images, bf16 (fused 2x2 max-pool)
    #   wt    : (C8, C)   bf16
    #   w_gp  : (C2+C8, C) bf16  -- [Wg ; Wp] fused
    #   wo    : (C, C2)   bf16  -- gamma already folded in
    #   out   : (1, C, TQ) f32
    f32, bf16 = jnp.float32, jnp.bfloat16

    x_tile_f32 = x_cs_ref[0]                               # (C, TQ) f32
    x_tile = x_tile_f32.astype(bf16)

    wt = wt_ref[...]                                       # (C8, C)
    w_gp = w_gp_ref[...]                                   # (C2+C8, C)
    wo = wo_ref[...]                                       # (C, C2)

    # theta projection for this query tile: (C8, TQ)
    theta = jnp.dot(wt, x_tile, preferred_element_type=f32)

    # phi/g projections fused with the 2x2 max-pool:
    #   maxpool2x2(W @ x) == elementwise max over W @ x_decimated_k
    pg = jnp.dot(w_gp, x_dec_ref[0, 0], preferred_element_type=f32)     # (C2+C8, S4)
    for k in range(1, 4):
        pg = jnp.maximum(pg, jnp.dot(w_gp, x_dec_ref[0, k],
                                     preferred_element_type=f32))
    g_p = pg[:c2].astype(bf16)                             # (C2, S4)  (8-aligned slice)
    phi_p = pg[c2:].astype(bf16)                           # (C8, S4)

    # attention logits: logits[s, t] = <theta[:, s], phi_p[:, t]>   -> (TQ, S4)
    logits = jax.lax.dot_general(theta.astype(bf16), phi_p,
                                 (((0,), (0,)), ((), ())),
                                 preferred_element_type=f32)

    # numerically stable softmax numerator; normalization deferred past the value matmuls
    m = jnp.max(logits, axis=-1, keepdims=True)
    e = jnp.exp(logits - m).astype(bf16)                   # (TQ, S4)

    # row sums, lane-oriented as (1, TQ) so they broadcast over the (C, TQ) output
    denom = jax.lax.dot_general(jnp.ones((1, e.shape[-1]), bf16), e,
                                (((1,), (1,)), ((), ())),
                                preferred_element_type=f32)             # (1, TQ)

    # o_pre[c, s] = sum_t g_p[c, t] * e[s, t]   -> (C2, TQ)
    o_pre = jax.lax.dot_general(g_p, e, (((1,), (1,)), ((), ())),
                                preferred_element_type=f32)

    # output 1x1 conv (gamma pre-folded into wo), softmax normalization, residual
    o = jnp.dot(wo, o_pre.astype(bf16), preferred_element_type=f32)     # (C, TQ)
    out_ref[0] = (o * pl.reciprocal(denom, approx=True)
                  + x_tile_f32).astype(out_ref.dtype)


# ---------------------------------------------------------------------------
# Glue helpers (plain JAX)
# ---------------------------------------------------------------------------
def _spectral_normalize(w, n_iter=50, eps=1e-12):
    # PyTorch nn.utils.spectral_norm semantics: divide by the largest singular value,
    # estimated with power iteration (run to convergence).  No SVD in the forward path.
    # TODO(synk): torch keeps a persistent `u` buffer and runs 1 iteration per forward;
    # here it is re-estimated from a fixed u0 each call.
    def body(_, u):
        v = w.T @ u
        v = v / (jnp.linalg.norm(v) + eps)
        u = w @ v
        u = u / (jnp.linalg.norm(u) + eps)
        return u

    u0 = jnp.full((w.shape[0],), 1.0 / (w.shape[0] ** 0.5), w.dtype)
    u = jax.lax.fori_loop(0, n_iter, body, u0)
    v = w.T @ u
    v = v / (jnp.linalg.norm(v) + eps)
    sigma = u @ (w @ v)
    return w / sigma


# ---------------------------------------------------------------------------
# Wrapper: full AttentionBlock forward (one pallas_call)
# ---------------------------------------------------------------------------
def _attention_block_impl(x_nchw, w_theta, w_phi, w_g, w_o, gamma):
    B, C, H, W = x_nchw.shape
    S, S4 = H * W, (H * W) // 4
    C8, C2 = C // 8, C // 2

    # spectral-normalized 1x1 conv weights, pre-cast to bf16 (MXU operands only)
    wt_bf = _spectral_normalize(w_theta).astype(jnp.bfloat16)                 # (C8, C)
    w_gp_bf = jnp.concatenate(
        [_spectral_normalize(w_g), _spectral_normalize(w_phi)], axis=0
    ).astype(jnp.bfloat16)                                                    # (C2+C8, C)
    wo_bf = (jnp.asarray(gamma, jnp.float32)
             * _spectral_normalize(w_o)).astype(jnp.bfloat16)                 # (C, C2)

    # residual/theta source stays f32; decimated sub-images (fused pool) go bf16
    x_cs = x_nchw.reshape(B, C, S)                                            # (B, C, S)
    x_dec = jnp.stack(
        [x_nchw[:, :, a::2, b::2].reshape(B, C, S4)
         for a in (0, 1) for b in (0, 1)], axis=1
    ).astype(jnp.bfloat16)                                                    # (B, 4, C, S4)

    # query-axis tile: bounds VMEM at O(TQ*S4) and adds a second parallel grid axis
    TQ = 128 if (S % 128 == 0 and S > 128) else S
    n_q = S // TQ

    # explicit scoped-VMEM budget sized to the working set (with headroom)
    per_step = (2 * (2 * C * TQ * 4)                 # x tile + out tile, double-buffered
                + 2 * (4 * C * S4 * 2)               # decimated x (bf16)
                + 2 * 2 * (C8 * C + (C2 + C8) * C + C * C2)   # weights (bf16)
                + 3 * TQ * S4 * 4 + 8 * C * TQ * 4)  # logits/e + small tiles
    vmem_limit = int(min(max(2 * per_step, 16 * 1024 * 1024), 48 * 1024 * 1024))

    flops = 2 * B * (C8 * C * S                      # theta
                     + 4 * (C2 + C8) * C * S4        # pooled phi/g projections
                     + C8 * S * S4                   # logits
                     + S * S4                        # row sums
                     + C2 * S4 * S                   # value aggregation
                     + C * C2 * S)                   # output conv
    bytes_accessed = B * (2 * C * S * 4 + C * S * 2) \
        + 2 * (C8 * C + (C2 + C8) * C + C * C2)

    kernel = functools.partial(_attn_block_kernel, c2=C2)

    out_cs = pl.pallas_call(
        kernel,
        out_shape=jax.ShapeDtypeStruct((B, C, S), jnp.float32),
        grid=(B, n_q),
        in_specs=[
            pl.BlockSpec((1, C, TQ), lambda b, q: (b, 0, q)),        # x, channels-first (f32)
            pl.BlockSpec((1, 4, C, S4), lambda b, q: (b, 0, 0, 0)),  # decimated x (bf16)
            pl.BlockSpec((C8, C), lambda b, q: (0, 0)),              # Wt
            pl.BlockSpec((C2 + C8, C), lambda b, q: (0, 0)),         # [Wg; Wp]
            pl.BlockSpec((C, C2), lambda b, q: (0, 0)),              # gamma * Wo
        ],
        out_specs=pl.BlockSpec((1, C, TQ), lambda b, q: (b, 0, q)),
        compiler_params=pltpu.CompilerParams(
            dimension_semantics=("parallel", "parallel"),
            vmem_limit_bytes=vmem_limit),
        cost_estimate=pl.CostEstimate(flops=flops,
                                      transcendentals=B * S * S4,
                                      bytes_accessed=bytes_accessed),
    )(x_cs, x_dec, wt_bf, w_gp_bf, wo_bf)

    return out_cs.reshape(B, C, H, W)


attention_block = jax.jit(_attention_block_impl)


# ---------------------------------------------------------------------------
# Pure-JAX reference (mirrors the PyTorch forward, NCHW; SVD-based spectral norm
# gives an independent check of the power-iteration path)
# ---------------------------------------------------------------------------
def _spectral_normalize_svd(w2d):
    sigma = jnp.linalg.svd(w2d, compute_uv=False)[0]
    return w2d / sigma


def _reference(x, w_theta, w_phi, w_g, w_o, gamma):
    B, C, H, W = x.shape
    S = H * W
    wt = _spectral_normalize_svd(w_theta)
    wp = _spectral_normalize_svd(w_phi)
    wg = _spectral_normalize_svd(w_g)
    wo = _spectral_normalize_svd(w_o)

    def conv1x1(t, w):
        return jnp.einsum('bchw,oc->bohw', t, w)

    def pool(t):
        Bc, D, Hh, Ww = t.shape
        return jnp.max(t.reshape(Bc, D, Hh // 2, 2, Ww // 2, 2), axis=(3, 5))

    theta = conv1x1(x, wt)
    phi = pool(conv1x1(x, wp))
    g = pool(conv1x1(x, wg))
    theta = theta.reshape(B, C // 8, S)
    phi = phi.reshape(B, C // 8, S // 4)
    g = g.reshape(B, C // 2, S // 4)
    beta = jax.nn.softmax(jnp.einsum('bcs,bct->bst', theta, phi), axis=-1)
    o = jnp.einsum('bct,bst->bcs', g, beta).reshape(B, C // 2, H, W)
    o = conv1x1(o, wo)
    return gamma * o + x


if __name__ == "__main__":
    B, C, H, W = 2, 32, 16, 16

    key = jax.random.PRNGKey(0)
    kx, k1, k2, k3, k4 = jax.random.split(key, 5)
    x = jax.random.normal(kx, (B, C, H, W), jnp.float32)
    w_theta = 0.1 * jax.random.normal(k1, (C // 8, C), jnp.float32)
    w_phi   = 0.1 * jax.random.normal(k2, (C // 8, C), jnp.float32)
    w_g     = 0.1 * jax.random.normal(k3, (C // 2, C), jnp.float32)
    w_o     = 0.1 * jax.random.normal(k4, (C, C // 2), jnp.float32)
    # nn.Parameter gamma initializes to 0.0; use 0.5 so the attention path contributes.
    gamma = jnp.float32(0.5)

    out = attention_block(x, w_theta, w_phi, w_g, w_o, gamma)
    out = jax.block_until_ready(out)

    ref = _reference(x, w_theta, w_phi, w_g, w_o, gamma)
    max_err = float(jnp.max(jnp.abs(out - ref)))
    assert out.shape == (B, C, H, W), out.shape
    assert max_err < 1e-1, f"max abs error {max_err}"
    print("KERNEL_OK")
</pallas_src>

<mosaic_0001>
module attributes {stable_mosaic.version = 11 : i64} {
  func.func @_attn_block_kernel(%arg0: i32, %arg1: i32, %arg2: memref<1x32x128xf32, #tpu.memory_space<vmem>>, %arg3: memref<1x4x32x64xbf16, #tpu.memory_space<vmem>>, %arg4: memref<4x32xbf16, #tpu.memory_space<vmem>>, %arg5: memref<20x32xbf16, #tpu.memory_space<vmem>>, %arg6: memref<32x16xbf16, #tpu.memory_space<vmem>>, %arg7: memref<1x32x128xf32, #tpu.memory_space<vmem>>) attributes {dimension_semantics = [#tpu.dimension_semantics<parallel>, #tpu.dimension_semantics<parallel>], iteration_bounds = array<i64: 2, 2>, scalar_prefetch = 0 : i64, scratch_operands = 0 : i64, tpu.core_type = #tpu.core_type<tc>, window_params = [{transform_indices = @transform_0, window_bounds = array<i64: 1, 32, 128>}, {transform_indices = @transform_1, window_bounds = array<i64: 1, 4, 32, 64>}, {pipeline_mode = #tpu.pipeline_mode<synchronous>, transform_indices = @transform_2, window_bounds = array<i64: 4, 32>}, {pipeline_mode = #tpu.pipeline_mode<synchronous>, transform_indices = @transform_3, window_bounds = array<i64: 20, 32>}, {pipeline_mode = #tpu.pipeline_mode<synchronous>, transform_indices = @transform_4, window_bounds = array<i64: 32, 16>}, {transform_indices = @transform_5, window_bounds = array<i64: 1, 32, 128>}]} {
    %c0 = arith.constant 0 : index
    %c0_0 = arith.constant 0 : index
    %c0_1 = arith.constant 0 : index
    %0 = vector.load %arg2[%c0, %c0_0, %c0_1] : memref<1x32x128xf32, #tpu.memory_space<vmem>>, vector<1x32x128xf32>
    %1 = vector.shape_cast %0 : vector<1x32x128xf32> to vector<32x128xf32>
    %2 = arith.truncf %1 : vector<32x128xf32> to vector<32x128xbf16>
    %c0_2 = arith.constant 0 : index
    %c0_3 = arith.constant 0 : index
    %3 = vector.load %arg4[%c0_2, %c0_3] : memref<4x32xbf16, #tpu.memory_space<vmem>>, vector<4x32xbf16>
    %c0_4 = arith.constant 0 : index
    %c0_5 = arith.constant 0 : index
    %4 = vector.load %arg5[%c0_4, %c0_5] : memref<20x32xbf16, #tpu.memory_space<vmem>>, vector<20x32xbf16>
    %c0_6 = arith.constant 0 : index
    %c0_7 = arith.constant 0 : index
    %5 = vector.load %arg6[%c0_6, %c0_7] : memref<32x16xbf16, #tpu.memory_space<vmem>>, vector<32x16xbf16>
    %cst = arith.constant dense<0.000000e+00> : vector<4x128xf32>
    %6 = tpu.matmul %3, %2, %cst {dimension_numbers = #tpu.dot_dimension_numbers<[1], [0], [0], [1], [0, 0, 1, 1], [], []>} : vector<4x32xbf16>, vector<32x128xbf16>, vector<4x128xf32> -> vector<4x128xf32>
    %c0_8 = arith.constant 0 : index
    %c0_9 = arith.constant 0 : index
    %c0_10 = arith.constant 0 : index
    %c0_11 = arith.constant 0 : index
    %7 = vector.load %arg3[%c0_8, %c0_9, %c0_10, %c0_11] : memref<1x4x32x64xbf16, #tpu.memory_space<vmem>>, vector<1x1x32x64xbf16>
    %8 = vector.shape_cast %7 : vector<1x1x32x64xbf16> to vector<32x64xbf16>
    %cst_12 = arith.constant dense<0.000000e+00> : vector<20x64xf32>
    %9 = tpu.matmul %4, %8, %cst_12 {dimension_numbers = #tpu.dot_dimension_numbers<[1], [0], [0], [1], [0, 0, 1, 1], [], []>} : vector<20x32xbf16>, vector<32x64xbf16>, vector<20x64xf32> -> vector<20x64xf32>
    %c0_13 = arith.constant 0 : index
    %c1 = arith.constant 1 : index
    %c0_14 = arith.constant 0 : index
    %c0_15 = arith.constant 0 : index
    %10 = vector.load %arg3[%c0_13, %c1, %c0_14, %c0_15] : memref<1x4x32x64xbf16, #tpu.memory_space<vmem>>, vector<1x1x32x64xbf16>
    %11 = vector.shape_cast %10 : vector<1x1x32x64xbf16> to vector<32x64xbf16>
    %cst_16 = arith.constant dense<0.000000e+00> : vector<20x64xf32>
    %12 = tpu.matmul %4, %11, %cst_16 {dimension_numbers = #tpu.dot_dimension_numbers<[1], [0], [0], [1], [0, 0, 1, 1], [], []>} : vector<20x32xbf16>, vector<32x64xbf16>, vector<20x64xf32> -> vector<20x64xf32>
    %13 = arith.maximumf %9, %12 : vector<20x64xf32>
    %c0_17 = arith.constant 0 : index
    %c2 = arith.constant 2 : index
    %c0_18 = arith.constant 0 : index
    %c0_19 = arith.constant 0 : index
    %14 = vector.load %arg3[%c0_17, %c2, %c0_18, %c0_19] : memref<1x4x32x64xbf16, #tpu.memory_space<vmem>>, vector<1x1x32x64xbf16>
    %15 = vector.shape_cast %14 : vector<1x1x32x64xbf16> to vector<32x64xbf16>
    %cst_20 = arith.constant dense<0.000000e+00> : vector<20x64xf32>
    %16 = tpu.matmul %4, %15, %cst_20 {dimension_numbers = #tpu.dot_dimension_numbers<[1], [0], [0], [1], [0, 0, 1, 1], [], []>} : vector<20x32xbf16>, vector<32x64xbf16>, vector<20x64xf32> -> vector<20x64xf32>
    %17 = arith.maximumf %13, %16 : vector<20x64xf32>
    %c0_21 = arith.constant 0 : index
    %c3 = arith.constant 3 : index
    %c0_22 = arith.constant 0 : index
    %c0_23 = arith.constant 0 : index
    %18 = vector.load %arg3[%c0_21, %c3, %c0_22, %c0_23] : memref<1x4x32x64xbf16, #tpu.memory_space<vmem>>, vector<1x1x32x64xbf16>
    %19 = vector.shape_cast %18 : vector<1x1x32x64xbf16> to vector<32x64xbf16>
    %cst_24 = arith.constant dense<0.000000e+00> : vector<20x64xf32>
    %20 = tpu.matmul %4, %19, %cst_24 {dimension_numbers = #tpu.dot_dimension_numbers<[1], [0], [0], [1], [0, 0, 1, 1], [], []>} : vector<20x32xbf16>, vector<32x64xbf16>, vector<20x64xf32> -> vector<20x64xf32>
    %21 = arith.maximumf %17, %20 : vector<20x64xf32>
    %22 = vector.extract_strided_slice %21 {offsets = [0, 0], sizes = [16, 64], strides = [1, 1]} : vector<20x64xf32> to vector<16x64xf32>
    %23 = arith.truncf %22 : vector<16x64xf32> to vector<16x64xbf16>
    %24 = vector.extract_strided_slice %21 {offsets = [16, 0], sizes = [4, 64], strides = [1, 1]} : vector<20x64xf32> to vector<4x64xf32>
    %25 = arith.truncf %24 : vector<4x64xf32> to vector<4x64xbf16>
    %26 = arith.truncf %6 : vector<4x128xf32> to vector<4x128xbf16>
    %cst_25 = arith.constant dense<0.000000e+00> : vector<128x64xf32>
    %27 = tpu.matmul %26, %25, %cst_25 {dimension_numbers = #tpu.dot_dimension_numbers<[0], [0], [1], [1], [0, 1, 1, 1], [], []>} : vector<4x128xbf16>, vector<4x64xbf16>, vector<128x64xf32> -> vector<128x64xf32>
    %cst_26 = arith.constant dense<0xFF800000> : vector<128xf32>
    %28 = vector.multi_reduction <maximumf>, %27, %cst_26 [1] : vector<128x64xf32> to vector<128xf32>
    %29 = vector.shape_cast %28 : vector<128xf32> to vector<128x1xf32>
    %30 = vector.broadcast %29 : vector<128x1xf32> to vector<128x64xf32>
    %31 = arith.subf %27, %30 : vector<128x64xf32>
    %32 = math.exp %31 : vector<128x64xf32>
    %33 = arith.truncf %32 : vector<128x64xf32> to vector<128x64xbf16>
    %cst_27 = arith.constant 1.000000e+00 : bf16
    %34 = vector.broadcast %cst_27 : bf16 to vector<1x64xbf16>
    %cst_28 = arith.constant dense<0.000000e+00> : vector<1x128xf32>
    %35 = tpu.matmul %34, %33, %cst_28 {dimension_numbers = #tpu.dot_dimension_numbers<[1], [1], [0], [0], [0, 0, 1, 0], [], []>} : vector<1x64xbf16>, vector<128x64xbf16>, vector<1x128xf32> -> vector<1x128xf32>
    %cst_29 = arith.constant dense<0.000000e+00> : vector<16x128xf32>
    %36 = tpu.matmul %23, %33, %cst_29 {dimension_numbers = #tpu.dot_dimension_numbers<[1], [1], [0], [0], [0, 0, 1, 0], [], []>} : vector<16x64xbf16>, vector<128x64xbf16>, vector<16x128xf32> -> vector<16x128xf32>
    %37 = arith.truncf %36 : vector<16x128xf32> to vector<16x128xbf16>
    %cst_30 = arith.constant dense<0.000000e+00> : vector<32x128xf32>
    %38 = tpu.matmul %5, %37, %cst_30 {dimension_numbers = #tpu.dot_dimension_numbers<[1], [0], [0], [1], [0, 0, 1, 1], [], []>} : vector<32x16xbf16>, vector<16x128xbf16>, vector<32x128xf32> -> vector<32x128xf32>
    %39 = tpu.reciprocal %35 {approx = true} : vector<1x128xf32> -> vector<1x128xf32>
    %40 = vector.broadcast %39 : vector<1x128xf32> to vector<32x128xf32>
    %41 = arith.mulf %38, %40 : vector<32x128xf32>
    %42 = arith.addf %41, %1 : vector<32x128xf32>
    %c0_31 = arith.constant 0 : index
    %c0_32 = arith.constant 0 : index
    %c0_33 = arith.constant 0 : index
    %43 = vector.load %arg7[%c0_31, %c0_32, %c0_33] : memref<1x32x128xf32, #tpu.memory_space<vmem>>, vector<1x32x128xf32>
    %44 = vector.shape_cast %43 : vector<1x32x128xf32> to vector<32x128xf32>
    %45 = vector.shape_cast %42 : vector<32x128xf32> to vector<1x32x128xf32>
    tpu.vector_store %arg7[%c0_31, %c0_32, %c0_33], %45 {strides = array<i32>} : memref<1x32x128xf32, #tpu.memory_space<vmem>>, vector<1x32x128xf32>,
    return
  }
  func.func @transform_0(%arg0: i32, %arg1: i32) -> (i32, i32, i32) {
    %c0_i32 = arith.constant 0 : i32
    %c0_i32_0 = arith.constant 0 : i32
    return %arg0, %c0_i32, %arg1 : i32, i32, i32
  }
  func.func @transform_1(%arg0: i32, %arg1: i32) -> (i32, i32, i32, i32) {
    %c0_i32 = arith.constant 0 : i32
    %c0_i32_0 = arith.constant 0 : i32
    %c0_i32_1 = arith.constant 0 : i32
    %c0_i32_2 = arith.constant 0 : i32
    return %arg0, %c0_i32, %c0_i32_0, %c0_i32_1 : i32, i32, i32, i32
  }
  func.func @transform_2(%arg0: i32, %arg1: i32) -> (i32, i32) {
    %c0_i32 = arith.constant 0 : i32
    %c0_i32_0 = arith.constant 0 : i32
    %c0_i32_1 = arith.constant 0 : i32
    return %c0_i32, %c0_i32_0 : i32, i32
  }
  func.func @transform_3(%arg0: i32, %arg1: i32) -> (i32, i32) {
    %c0_i32 = arith.constant 0 : i32
    %c0_i32_0 = arith.constant 0 : i32
    %c0_i32_1 = arith.constant 0 : i32
    return %c0_i32, %c0_i32_0 : i32, i32
  }
  func.func @transform_4(%arg0: i32, %arg1: i32) -> (i32, i32) {
    %c0_i32 = arith.constant 0 : i32
    %c0_i32_0 = arith.constant 0 : i32
    %c0_i32_1 = arith.constant 0 : i32
    return %c0_i32, %c0_i32_0 : i32, i32
  }
  func.func @transform_5(%arg0: i32, %arg1: i32) -> (i32, i32, i32) {
    %c0_i32 = arith.constant 0 : i32
    %c0_i32_0 = arith.constant 0 : i32
    return %arg0, %c0_i32, %arg1 : i32, i32, i32
  }
}

</mosaic_0001>

<bundles_post_ra>
// kernel: custom-call.1
= control target key start
LH: loop header
LB: loop body
LE: loop exit
PB: predicated region body
PF: predicated region fallthrough
CT: control target
= control target key end

     0   :  { %s6_s0 = inlined_call_operand.vmem [shape: f32[16], index: 0, kind: output, shape index: {}]  }

// kernel: custom-call.2
= control target key start
LH: loop header
LB: loop body
LE: loop exit
PB: predicated region body
PF: predicated region fallthrough
CT: control target
= control target key end

     0   :  { %s6_s0 = inlined_call_operand.vmem [shape: f32[4], index: 0, kind: output, shape index: {}]  }

// kernel: custom-call.3
= control target key start
LH: loop header
LB: loop body
LE: loop exit
PB: predicated region body
PF: predicated region fallthrough
CT: control target
= control target key end

     0   :  { %s6_s0 = inlined_call_operand.vmem [shape: f32[32], index: 0, kind: output, shape index: {}]  }

// kernel: _attention_block_impl.1
= control target key start
LH: loop header
LB: loop body
LE: loop exit
PB: predicated region body
PF: predicated region fallthrough
CT: control target
= control target key end

     0   :  { %s1641_s18 = smov 0   ;;  %s1643_s19 = smov 0   ;;  %s1887_s0 = inlined_call_operand.vmem [shape: f32[2,32,256], index: 0, kind: input, shape index: {}]   ;;  %s1888_s1 = inlined_call_operand.vmem [shape: bf16[2,4,32,64], index: 1, kind: input, shape index: {}]   ;;  %s1889_s2 = inlined_call_operand.vmem [shape: bf16[4,32], index: 2, kind: input, shape index: {}]   ;;  %s1890_s3 = inlined_call_operand.vmem [shape: bf16[20,32], index: 3, kind: input, shape index: {}]   ;;  %s1891_s4 = inlined_call_operand.vmem [shape: bf16[32,16], index: 4, kind: input, shape index: {}]   ;;  %s1892_s5 = inlined_call_operand.vmem [shape: f32[2,32,256], index: 5, kind: output, shape index: {}]  }
   0x1   :  { %s1645_s20 = smov 0   ;;  %s1647_s21 = smov 0  }
   0x2   :  { %s1649_s22 = smov 0   ;;  %s1651_s23 = smov 0  }
   0x3   :  { %s1653_s24 = smov 0  }
   0x4 LB: > { %s24_s25 = sadd.s32 1, %s1598_s22  ;;  %s27_s26 = sadd.s32 1, %s1602_s23  ;;  %s1606_s24 = sphi %s1653_s24, %s15_s24   ;;  %s1602_s23 = sphi %s1651_s23, %s1899_s23   ;;  %s1598_s22 = sphi %s1649_s22, %s1898_s22   ;;  %s1594_s21 = sphi %s1647_s21, %s1897_s21   ;;  %s1590_s20 = sphi %s1645_s20, %s1896_s20   ;;  %s1586_s19 = sphi %s1643_s19, %s1895_s19   ;;  %s1582_s18 = sphi %s1641_s18, %s1894_s18  }
   0x5   : > { %p25_p0 = scmp.ge.s32.totalorder %s24_s25, 2  ;;  %s1229_s27 = sadd.s32 4294967295, %s1606_s24  }
   0x6   : > { %p43_p1 = scmp.ne.s32.totalorder %s1586_s19, %s1582_s18  ;;  %p44_p2 = scmp.eq.s32.totalorder %s1606_s24, 0 }
   0x7   : > { %s1901_s25 = smov (%p25_p0, %s24_s25), 0  ;;  %s1903_s26 = smov (!%p25_p0, %s27_s26), %s1602_s23 }
   0x8   : > { %p29_p3 = scmp.ge.s32.totalorder %s1903_s26, 2  ;;  %p164_p4 = scmp.eq.s32.totalorder %s1229_s27, 3 }
   0x9   : > { %s32_s28 = ssub.s32 %s1598_s22, %s1901_s25  ;;  %p45_p5 = por %p44_p2, %p43_p1 }
   0xa   : > { %s1905_s26 = smov (%p29_p3, %s1903_s26), 0  ;;  %p1689_p6 = por %p164_p4, %p43_p1 }
   0xb   : > { %s31_s30 = ssub.s32 %s1602_s23, %s1905_s26  ;;  %s36_s7 = sadd.s32 1, %s1586_s19 }
   0xc   : > { %s33_s6 = sor.u32 %s32_s28, %s31_s30  ;;  %p1232_p8 = scmp.ge.s32.totalorder %s1606_s24, 4 }
   0xd   : > { %p34_p7 = scmp.eq.s32.totalorder %s33_s6, 0 }
   0xe   : > { %195 = sbr.rel (%p1232_p8) target bundleno = 29 (0x1d), region = 28 }
   0xf   : > { %s1697_s8 = scalar_select %p34_p7, %s1586_s19, %s36_s7  }
  0x15   : > { %198 = sbr.rel (!%p45_p5) target bundleno = 29 (0x1d), region = 32  ;;  %s200_s9 = sand.u32 (%p45_p5), 1, %s1586_s19  }
  0x16   : > { %s1234_s10 = sshll.u32 (%p45_p5), %s1602_s23, 3  ;;  %s1233_s11 = sshll.u32 (%p45_p5), %s200_s9, 5 }
  0x17   : > { %s204_s12 = sadd.s32 (%p45_p5), %s1598_s22, %s1234_s10  ;;  %s202_s17 = scalar_lea.vmem (%p45_p5), [#allocation2], %s1233_s11 }
  0x18   : > { %s1235_s13 = sshll.u32 (%p45_p5), %s204_s12, 3 }
  0x19   : > { %s206_s16 = scalar_lea.vmem (%p45_p5), %s1887_s0, %s1235_s13 }
  0x1a   : > { %v240_v0 = vld [vmem:[%s206_s16] sm:$0xff] (%p45_p5)  ;;  %v242_v1 = vld [vmem:[%s206_s16 + $0x10] sm:$0xff] (%p45_p5) }
  0x1b   : > { %v244_v2 = vld [vmem:[%s206_s16 + $0x20] sm:$0xff] (%p45_p5)  ;;  %241 = vst [vmem:[%s202_s17] sm:$0xff] (%p45_p5), %v240_v0  ;;  %243 = vst [vmem:[%s202_s17 + $0x8] sm:$0xff] (%p45_p5), %v242_v1  ;;  %v246_v3 = vld [vmem:[%s206_s16 + $0x30] sm:$0xff] (%p45_p5) }
  0x1c   : > { %245 = vst [vmem:[%s202_s17 + $0x10] sm:$0xff] %v244_v2  ;;  %247 = vst [vmem:[%s202_s17 + $0x18] sm:$0xff] %v246_v3 }
  0x1d PF: > { %p1236_p9 = scmp.ge.s32.totalorder %s1606_s24, 1  ;;  %p260_p10 = scmp.lt.s32.totalorder %s1606_s24, 5 }
  0x1f   : > { %p261_p11 = pnand %p1236_p9, %p260_p10 }
  0x20   : > { %s267_s27 = sand.u32 (!%p261_p11), 1, %s1582_s18   ;;  %v1608_v4 = vmov (!%p261_p11), 0.0   ;;  %vm1609_vm0 = vmmov (!%p261_p11), 0   ;;  %p298_p12 = scmp.lt.s32.totalorder (!%p261_p11), %s1594_s21, 1  ;;  %v1510_v5 = vld [vmem:[%s1890_s3] sm:$0xff] (!%p261_p11)   ;;  %vm319_vm1 = vcmask (!%p261_p11), 261120  }
  0x21   : > { %264 = sbr.rel (%p261_p11) target bundleno = 1254 (0x4e6), region = 74  ;;  %1341 = vmatprep.subr.bf16.mxu0 (!%p261_p11), %v1608_v4  ;;  %s1710_s28 = sshll.u32 (!%p261_p11), %s267_s27, 5  ;;  %1345 = vmatprep.mubr.msk.bf16.mxu0 (!%p261_p11), %vm1609_vm0, %v1608_v4  ;;  %v311_v13 = vld [vmem:[%s1889_s2] sm:$0x3] (!%p261_p11)  ;;  %vm689_vm2 = vcmask (!%p261_p11), 1041408   ;;  %vm664_vm3 = vcmask (!%p261_p11), 31744  }
  0x22   : > { %s269_s7 = scalar_lea.vmem (!%p261_p11), [#allocation2], %s1710_s28  ;;  %1353 = vmatprep.mubr.msk.bf16.mxu1 (!%p261_p11), %vm319_vm1, %v1510_v5  ;;  %v1511_v17 = vld [vmem:[%s1890_s3 + $0x8] ss:$0 sps:$4 sm:$0x33] (!%p261_p11)   ;;  %vm790_vm4 = vcmask (!%p261_p11), 523264   ;;  %vm1017_vm5 = vcmask (!%p261_p11), 130048  }
  0x23   : > { %v1719_v6 = vld [vmem:[%s269_s7] sm:$0xff] (!%p261_p11)  ;;  %v1721_v7 = vld [vmem:[%s269_s7 + $0x8] sm:$0xff] (!%p261_p11)  ;;  %v1723_v8 = vld [vmem:[%s269_s7 + $0x10] sm:$0xff] (!%p261_p11) }
  0x24   : > { %v309_v9 = vpack.c.bf16 (!%p261_p11), %v1721_v7, %v1719_v6  ;;  %v1728_v10 = vld [vmem:[%s269_s7 + $0x18] sm:$0xff] (!%p261_p11)  ;;  %s297_s7 = scalar_lea.vmem (!%p261_p11), [#allocation3], %s1710_s28 }
  0x25   : > { %v310_v11 = vpack.c.bf16 (!%p261_p11), %v1728_v10, %v1723_v8 }
  0x26   : > { %1342 = vmatpush3.bf16.msra.mxu0 (!%p261_p11), %v309_v9 }
  0x27   : > { %1343 = vmatprep.subr.bf16.mxu0 (!%p261_p11), %v1608_v4 }
  0x28   : > { %s299_s18 = scalar_select %p298_p12, %s1594_s21, 1 }
  0x2a   : > { %s1291_s9 = sshll.u32 %s299_s18, 6  ;;  %1344 = vmatpush3.bf16.msra.mxu0 %v310_v11  ;;  %s1287_s18 = sshll.u32 (%p1689_p6), %s1594_s21, 3 }
  0x2b   : > { %s302_s12 = scalar_lea.vmem %s1888_s1, %s1291_s9  ;;  %s1098_s9 = sadd.s32 (%p1689_p6), %s1590_s20, %s1287_s18 }
  0x2c   : > { %v1506_v12 = vld [vmem:[%s302_s12] sm:$0xff]   ;;  %v1507_v14 = vld [vmem:[%s302_s12 + $0x10] sm:$0xff]   ;;  %v1508_v15 = vld [vmem:[%s302_s12 + $0x8] sm:$0xff]   ;;  %s1288_s28 = sshll.u32 (%p1689_p6), %s1098_s9, 3 }
  0x2d   : > { %1349 = vmatprep.subr.bf16.mxu1 %v1506_v12  ;;  %v1509_v16 = vld [vmem:[%s302_s12 + $0x18] sm:$0xff]   ;;  %1357 = vmatprep.subr.bf16.mxu0 %v1507_v14  ;;  %v1512_v18 = vld [vmem:[%s302_s12 + $0x20] sm:$0xff]   ;;  %v1513_v19 = vld [vmem:[%s302_s12 + $0x30] sm:$0xff]  }
  0x2e   : > { %1350 = vmatpush3.bf16.msra.mxu1 %v1506_v12  ;;  %1346 = vmatmul.mubr.msk.bf16.vlgmr.msra.gmra.mrb[0].mxu0 %vm319_vm1, %v311_v13  ;;  %v1514_v20 = vld [vmem:[%s302_s12 + $0x28] sm:$0xff]   ;;  %v1515_v21 = vld [vmem:[%s302_s12 + $0x38] sm:$0xff]   ;;  %s1100_s12 = scalar_lea.vmem (%p1689_p6), %s1892_s5, %s1288_s28 }
  0x2f   : > { %1351 = vmatprep.subr.bf16.mxu1 %v1508_v15  ;;  %1358 = vmatpush3.bf16.msra.mxu0 %v1507_v14 }
  0x30   : > { %1359 = vmatprep.subr.bf16.mxu0 %v1509_v16  ;;  %1361 = vmatprep.mubr.msk.bf16.mxu0 %vm319_vm1, %v1510_v5 }
  0x32   : > { %1352 = vmatpush3.bf16.msra.mxu1 %v1508_v15 }
  0x33   : > { %1365 = vmatprep.subr.bf16.mxu1 %v1512_v18  ;;  %1360 = vmatpush3.bf16.msra.mxu0 %v1509_v16 }
  0x34   : > { %1373 = vmatprep.subr.bf16.mxu0 %v1513_v19 }
  0x35   : > { %1354 = vmatmul.mubr.msk.bf16.vlgmr.msra.gmra.mrb[0].mxu1 %vm319_vm1, %v1511_v17 }
  0x36   : > { %1366 = vmatpush3.bf16.msra.mxu1 %v1512_v18  ;;  %1369 = vmatprep.mubr.msk.bf16.mxu1 %vm319_vm1, %v1510_v5 }
  0x37   : > { %1367 = vmatprep.subr.bf16.mxu1 %v1514_v20  ;;  %1362 = vmatmul.mubr.msk.bf16.vlgmr.msra.gmra.mrb[4].mxu0 %vm319_vm1, %v1511_v17 }
  0x38   : > { %1374 = vmatpush3.bf16.msra.mxu0 %v1513_v19  ;;  %1377 = vmatprep.mubr.msk.bf16.mxu0 %vm319_vm1, %v1510_v5 }
  0x39   : > { %1375 = vmatprep.subr.bf16.mxu0 %v1515_v21 }
  0x3a   : > { %1368 = vmatpush3.bf16.msra.mxu1 %v1514_v20 }
  0x3c   : > { %1376 = vmatpush3.bf16.msra.mxu0 %v1515_v21 }
  0x3d   : > { %1370 = vmatmul.mubr.msk.bf16.vlgmr.msra.gmra.mrb[4].mxu1 %vm319_vm1, %v1511_v17  ;;  %1399 = vmatprep.subr.bf16.mxu0 %v1608_v4 }
  0x3f   : > { %1378 = vmatmul.mubr.msk.bf16.vlgmr.msra.gmra.mrb[8].mxu0 %vm319_vm1, %v1511_v17 }
  0x40   : > { %1415 = vmatprep.mubr.msk.bf16.mxu0 %vm1609_vm0, %v1608_v4 }
 0x101   : > { %v357_v22 = vpop.f32.mrb[0].mxu0 }
 0x102   : > { %v1347_v23 = vpop.f32.mrb[1].mxu0  ;;  %v647_v24 = vpack.c.bf16 %v357_v22, %v357_v22 }
 0x103   : > { %v360_v25 = vpop.f32.mrb[2].mxu0 }
 0x104   : > { %648 = vxpose.xlu0.c.b16.start.end [1/1] (short) %v647_v24, 128  ;;  %v1348_v26 = vpop.f32.mrb[3].mxu0 }
 0x108   : > { %v1355_v27 = vpop.f32.mrb[0].mxu1 }
 0x109   : > { %v427_v28 = vpop.f32.mrb[1].mxu1 }
 0x10a   : > { %v1356_v29 = vpop.f32.mrb[2].mxu1  ;;  %v1363_v31 = vpop.f32.mrb[4].mxu0 }
 0x10b   : > { %v430_v30 = vpop.f32.mrb[3].mxu1  ;;  %v508_v32 = vmax.f32 %v1355_v27, %v1363_v31  ;;  %v492_v33 = vpop.f32.mrb[5].mxu0 }
 0x10c   : > { %v506_v34 = vmax.f32 %v427_v28, %v492_v33  ;;  %v1364_v35 = vpop.f32.mrb[6].mxu0 }
 0x10d   : > { %v495_v36 = vpop.f32.mrb[7].mxu0 }
 0x10e   : > { %v507_v38 = vmax.f32 %v430_v30, %v495_v36 }
 0x110   : > { %v1371_v37 = vpop.f32.mrb[4].mxu1 }
 0x111   : > { %v576_v39 = vmax.f32 %v508_v32, %v1371_v37  ;;  %v560_v40 = vpop.f32.mrb[5].mxu1 }
 0x112   : > { %v574_v41 = vmax.f32 %v506_v34, %v560_v40  ;;  %v1372_v42 = vpop.f32.mrb[6].mxu1  ;;  %v1379_v44 = vpop.f32.mrb[8].mxu0 }
 0x113   : > { %v563_v43 = vpop.f32.mrb[7].mxu1  ;;  %v644_v46 = vmax.f32 %v576_v39, %v1379_v44  ;;  %v628_v47 = vpop.f32.mrb[9].mxu0 }
 0x114   : > { %v575_v45 = vmax.f32 %v507_v38, %v563_v43  ;;  %v642_v48 = vmax.f32 %v574_v41, %v628_v47  ;;  %v1380_v49 = vpop.f32.mrb[10].mxu0 }
 0x115   : > { %v646_v50 = vpack.c.bf16 %v644_v46, %v644_v46  ;;  %v631_v51 = vpop.f32.mrb[11].mxu0 }
 0x116   : > { %v643_v52 = vmax.f32 %v575_v45, %v631_v51 }
 0x117   : > { %v691_v53 = vsel %vm689_vm2, %v646_v50, 0  ;;  %1445 = vmatprep.subr.msk.bf16.mxu1 %vm689_vm2, %v646_v50 }
 0x118   : > { %v1754_v54 = vpack.c.bf16 %v643_v52, %v642_v48  ;;  %1382 = vmatpush3.bf16.msra.mxu1 %v691_v53 }
 0x119   : > { %1419 = vmatprep.subr.bf16.mxu1 %v1608_v4 }
 0x16a   : > { %v656_v55 = vpop.trf.xlu0 }
 0x16b   : > { %1383 = vmatprep.mubr.msk.bf16.mxu1 %vm664_vm3, %v656_v55 }
 0x16e   : > { %v657_v56 = vpop.trf.xlu0 }
 0x16f   : > { %1384 = vmatmul.mubr.msk.bf16.vlgmr.msra.gmra.mrb[8].mxu1 %vm664_vm3, %v657_v56 }
 0x172   : > { %v658_v57 = vpop.trf.xlu0 }
 0x173   : > { %1387 = vmatprep.mubr.msk.bf16.mxu1 %vm664_vm3, %v658_v57 }
 0x176   : > { %v659_v58 = vpop.trf.xlu0 }
 0x177   : > { %1388 = vmatmul.mubr.msk.bf16.gmra.mrb[12].mxu1 %vm664_vm3, %v659_v58 }
 0x17a   : > { %v660_v59 = vpop.trf.xlu0 }
 0x17b   : > { %1391 = vmatprep.mubr.msk.bf16.mxu1 %vm664_vm3, %v660_v59 }
 0x17e   : > { %v661_v60 = vpop.trf.xlu0 }
 0x17f   : > { %1392 = vmatmul.mubr.msk.bf16.gmra.mrb[16].mxu1 %vm664_vm3, %v661_v60 }
 0x182   : > { %v662_v61 = vpop.trf.xlu0 }
 0x183   : > { %1395 = vmatprep.mubr.msk.bf16.mxu1 %vm664_vm3, %v662_v61 }
 0x186   : > { %v663_v62 = vpop.trf.xlu0 }
 0x187   : > { %1396 = vmatmul.mubr.msk.bf16.gmra.mrb[20].mxu1 %vm664_vm3, %v663_v62 }
 0x188   : > { %1435 = vmatprep.mubr.msk.bf16.mxu1 %vm1609_vm0, %v1608_v4 }
 0x242   : > { %v1385_v63 = vpop.f32.mrb[8].mxu1 }
 0x243   : > { %v727_v0 = vpop.f32.mrb[9].mxu1  ;;  %v797_v9 = vsel %vm790_vm4, %v1385_v63, -inf }
 0x244   : > { %v1386_v1 = vpop.f32.mrb[10].mxu1  ;;  %v791_v2 = vsel %vm790_vm4, %v727_v0, -inf }
 0x245   : > { %792 = vmax.xlane.f32.xlu0 %v791_v2  ;;  %v730_v3 = vpop.f32.mrb[11].mxu1  ;;  %v800_v15 = vsel %vm790_vm4, %v1386_v1, -inf }
 0x246   : > { %v794_v5 = vsel %vm790_vm4, %v730_v3, -inf }
 0x247   : > { %795 = vmax.xlane.f32.xlu1 %v794_v5 }
 0x24a   : > { %v1770_v11 = vpop.f32.mrb[12].mxu1 }
 0x24b   : > { %798 = vmax.xlane.f32.xlu1 %v797_v9  ;;  %v743_v12 = vpop.f32.mrb[13].mxu1  ;;  %v809_v23 = vsel %vm790_vm4, %v1770_v11, -inf }
 0x24c   : > { %v1772_v13 = vpop.f32.mrb[14].mxu1  ;;  %v803_v16 = vsel %vm790_vm4, %v743_v12, -inf }
 0x24d   : > { %v746_v14 = vpop.f32.mrb[15].mxu1  ;;  %v812_v27 = vsel %vm790_vm4, %v1772_v13, -inf }
 0x24e   : > { %v806_v21 = vsel %vm790_vm4, %v746_v14, -inf }
 0x24f   : > { %801 = vmax.xlane.f32.xlu1 %v800_v15 }
 0x252   : > { %v1776_v17 = vpop.f32.mrb[16].mxu1 }
 0x253   : > { %804 = vmax.xlane.f32.xlu1 %v803_v16  ;;  %v1778_v18 = vpop.f32.mrb[17].mxu1  ;;  %v821_v32 = vsel %vm790_vm4, %v1776_v17, -inf }
 0x254   : > { %v1780_v19 = vpop.f32.mrb[18].mxu1  ;;  %v815_v29 = vsel %vm790_vm4, %v1778_v18, -inf }
 0x255   : > { %v1782_v20 = vpop.f32.mrb[19].mxu1  ;;  %v824_v33 = vsel %vm790_vm4, %v1780_v19, -inf }
 0x256   : > { %v818_v31 = vsel %vm790_vm4, %v1782_v20, -inf }
 0x257   : > { %807 = vmax.xlane.f32.xlu1 %v806_v21 }
 0x25a   : > { %v1785_v22 = vpop.f32.mrb[20].mxu1 }
 0x25b   : > { %810 = vmax.xlane.f32.xlu1 %v809_v23  ;;  %v1789_v24 = vpop.f32.mrb[21].mxu1  ;;  %v833_v35 = vsel %vm790_vm4, %v1785_v22, -inf }
 0x25c   : > { %v1791_v25 = vpop.f32.mrb[22].mxu1  ;;  %v827_v34 = vsel %vm790_vm4, %v1789_v24, -inf }
 0x25d   : > { %v1793_v26 = vpop.f32.mrb[23].mxu1  ;;  %v836_v30 = vsel %vm790_vm4, %v1791_v25, -inf }
 0x25e   : > { %v830_v28 = vsel %vm790_vm4, %v1793_v26, -inf }
 0x25f   : > { %813 = vmax.xlane.f32.xlu1 %v812_v27  ;;  %831 = vmax.xlane.f32.xlu0 %v830_v28 }
 0x263   : > { %816 = vmax.xlane.f32.xlu1 %v815_v29  ;;  %837 = vmax.xlane.f32.xlu0 %v836_v30 }
 0x267   : > { %819 = vmax.xlane.f32.xlu1 %v818_v31 }
 0x26b   : > { %822 = vmax.xlane.f32.xlu1 %v821_v32 }
 0x26f   : > { %825 = vmax.xlane.f32.xlu1 %v824_v33 }
 0x273   : > { %828 = vmax.xlane.f32.xlu1 %v827_v34 }
 0x277   : > { %834 = vmax.xlane.f32.xlu1 %v833_v35 }
 0x2d2   : > { %v793_v36 = vpop.xlane.xlu0 %792 }
 0x2d3   : > { %v839_v37 = vsub.f32 %v727_v0, %v793_v36 }
 0x2d4   : > { %v796_v38 = vpop.xlane.xlu1 %795 }
 0x2d5   : > { %v855_v39 = vmul.f32 1.442695, %v839_v37  ;;  %v840_v40 = vsub.f32 %v730_v3, %v796_v38 }
 0x2d7   : > { %v857_v41 = vmul.f32 1.442695, %v840_v40  ;;  %1518 = vpow2.f32 %v855_v39 }
 0x2d8   : > { %v799_v42 = vpop.xlane.xlu1 %798 }
 0x2d9   : > { %1520 = vpow2.f32 %v857_v41  ;;  %v841_v43 = vsub.f32 %v1385_v63, %v799_v42 }
 0x2db   : > { %v859_v44 = vmul.f32 1.442695, %v841_v43 }
 0x2dc   : > { %v802_v45 = vpop.xlane.xlu1 %801 }
 0x2dd   : > { %v842_v46 = vsub.f32 %v1386_v1, %v802_v45  ;;  %1522 = vpow2.f32 %v859_v44 }
 0x2df   : > { %v861_v47 = vmul.f32 1.442695, %v842_v46 }
 0x2e0   : > { %v805_v48 = vpop.xlane.xlu1 %804 }
 0x2e1   : > { %1524 = vpow2.f32 %v861_v47  ;;  %v843_v49 = vsub.f32 %v743_v12, %v805_v48  ;;  %v1519_v50 = vpop.eup %1518 }
 0x2e3   : > { %v1521_v51 = vpop.eup %1520  ;;  %v863_v52 = vmul.f32 1.442695, %v843_v49 }
 0x2e4   : > { %v808_v53 = vpop.xlane.xlu1 %807  ;;  %v887_v55 = vpack.c.bf16 %v1521_v51, %v1519_v50 }
 0x2e5   : > { %v844_v56 = vsub.f32 %v746_v14, %v808_v53  ;;  %1526 = vpow2.f32 %v863_v52 }
 0x2e6   : > { %v899_v57 = vsel %vm790_vm4, %v887_v55, 0 }
 0x2e7   : > { %v865_v58 = vmul.f32 1.442695, %v844_v56  ;;  %1400 = vmatpush3.bf16.xpose.msra.mxu0 %v899_v57  ;;  %1420 = vmatpush3.bf16.xpose.msra.mxu1 %v899_v57  ;;  %v1523_v61 = vpop.eup %1522 }
 0x2e8   : > { %v811_v59 = vpop.xlane.xlu1 %810  ;;  %1401 = vmatprep.subr.bf16.mxu0 %v1608_v4  ;;  %1421 = vmatprep.subr.bf16.mxu1 %v1608_v4 }
 0x2e9   : > { %1528 = vpow2.f32 %v865_v58  ;;  %v845_v60 = vsub.f32 %v1770_v11, %v811_v59  ;;  %v1610_v59 = vmov 1065369472  }
 0x2eb   : > { %v1525_v62 = vpop.eup %1524  ;;  %v867_v63 = vmul.f32 1.442695, %v845_v60  ;;  %v1516_v60 = vld [vmem:[%s1891_s4] sm:$0xff]  }
 0x2ec   : > { %v814_v0 = vpop.xlane.xlu1 %813  ;;  %v888_v1 = vpack.c.bf16 %v1525_v62, %v1523_v61  ;;  %v832_v27 = vpop.xlane.xlu0 %831 }
 0x2ed   : > { %v846_v2 = vsub.f32 %v1772_v13, %v814_v0  ;;  %1530 = vpow2.f32 %v867_v63  ;;  %v852_v32 = vsub.f32 %v1793_v26, %v832_v27 }
 0x2ee   : > { %v902_v3 = vsel %vm790_vm4, %v888_v1, 0  ;;  %v1517_v1 = vld [vmem:[%s1891_s4 + $0x8] sm:$0xff]  }
 0x2ef   : > { %v869_v5 = vmul.f32 1.442695, %v846_v2  ;;  %1402 = vmatpush3.bf16.xpose.msra.mxu0 %v902_v3  ;;  %1422 = vmatpush3.bf16.xpose.msra.mxu1 %v902_v3  ;;  %v1527_v12 = vpop.eup %1526  ;;  %v881_v39 = vmul.f32 1.442695, %v852_v32 }
 0x2f0   : > { %v817_v9 = vpop.xlane.xlu1 %816  ;;  %1403 = vmatprep.subr.bf16.mxu0 %v1608_v4  ;;  %1423 = vmatprep.subr.bf16.mxu1 %v1608_v4  ;;  %v838_v35 = vpop.xlane.xlu0 %837 }
 0x2f1   : > { %1532 = vpow2.f32 %v869_v5  ;;  %v847_v11 = vsub.f32 %v1778_v18, %v817_v9  ;;  %v854_v40 = vsub.f32 %v1791_v25, %v838_v35  ;;  %v1074_v9 = vlaneseq }
 0x2f3   : > { %v1529_v14 = vpop.eup %1528  ;;  %v871_v15 = vmul.f32 1.442695, %v847_v11  ;;  %v885_v43 = vmul.f32 1.442695, %v854_v40  ;;  %v1075_v11 = vshrl.u32 %v1074_v9, 7 }
 0x2f4   : > { %v820_v16 = vpop.xlane.xlu1 %819  ;;  %v889_v21 = vpack.c.bf16 %v1529_v14, %v1527_v12 }
 0x2f5   : > { %v848_v13 = vsub.f32 %v1782_v20, %v820_v16  ;;  %1534 = vpow2.f32 %v871_v15  ;;  %v1076_v12 = vsub.s32 0, %v1075_v11 }
 0x2f6   : > { %v905_v23 = vsel %vm790_vm4, %v889_v21, 0 }
 0x2f7   : > { %v873_v28 = vmul.f32 1.442695, %v848_v13  ;;  %1404 = vmatpush3.bf16.xpose.msra.mxu0 %v905_v23  ;;  %1424 = vmatpush3.bf16.xpose.msra.mxu1 %v905_v23  ;;  %v1531_v30 = vpop.eup %1530 }
 0x2f8   : > { %v823_v29 = vpop.xlane.xlu1 %822  ;;  %1405 = vmatprep.subr.bf16.mxu0 %v1608_v4  ;;  %1425 = vmatprep.subr.bf16.mxu1 %v1608_v4 }
 0x2f9   : > { %1536 = vpow2.f32 %v873_v28  ;;  %v849_v18 = vsub.f32 %v1776_v17, %v823_v29 }
 0x2fb   : > { %v1533_v31 = vpop.eup %1532  ;;  %v875_v20 = vmul.f32 1.442695, %v849_v18 }
 0x2fc   : > { %v826_v33 = vpop.xlane.xlu1 %825  ;;  %v890_v34 = vpack.c.bf16 %v1533_v31, %v1531_v30 }
 0x2fd   : > { %v850_v36 = vsub.f32 %v1780_v19, %v826_v33  ;;  %1538 = vpow2.f32 %v875_v20 }
 0x2fe   : > { %v908_v37 = vsel %vm790_vm4, %v890_v34, 0 }
 0x2ff   : > { %v877_v38 = vmul.f32 1.442695, %v850_v36  ;;  %1406 = vmatpush3.bf16.xpose.msra.mxu0 %v908_v37  ;;  %1426 = vmatpush3.bf16.xpose.msra.mxu1 %v908_v37  ;;  %v1535_v41 = vpop.eup %1534 }
 0x300   : > { %v829_v17 = vpop.xlane.xlu1 %828  ;;  %1407 = vmatprep.subr.bf16.mxu0 %v1608_v4  ;;  %1427 = vmatprep.subr.bf16.mxu1 %v1608_v4 }
 0x301   : > { %1540 = vpow2.f32 %v877_v38  ;;  %v851_v26 = vsub.f32 %v1789_v24, %v829_v17 }
 0x302   : > { %1542 = vpow2.f32 %v881_v39 }
 0x303   : > { %v1537_v42 = vpop.eup %1536  ;;  %v879_v19 = vmul.f32 1.442695, %v851_v26 }
 0x304   : > { %v835_v44 = vpop.xlane.xlu1 %834  ;;  %v891_v45 = vpack.c.bf16 %v1537_v42, %v1535_v41 }
 0x305   : > { %1544 = vpow2.f32 %v879_v19  ;;  %v853_v46 = vsub.f32 %v1785_v22, %v835_v44 }
 0x306   : > { %v911_v25 = vsel %vm790_vm4, %v891_v45, 0  ;;  %1546 = vpow2.f32 %v885_v43 }
 0x307   : > { %v883_v47 = vmul.f32 1.442695, %v853_v46  ;;  %1408 = vmatpush3.bf16.xpose.msra.mxu0 %v911_v25  ;;  %1428 = vmatpush3.bf16.xpose.msra.mxu1 %v911_v25  ;;  %v1539_v24 = vpop.eup %1538 }
 0x308   : > { %1409 = vmatprep.subr.bf16.mxu0 %v1608_v4  ;;  %1429 = vmatprep.subr.bf16.mxu1 %v1608_v4 }
 0x309   : > { %1548 = vpow2.f32 %v883_v47 }
 0x30b   : > { %v1541_v48 = vpop.eup %1540 }
 0x30c   : > { %v892_v49 = vpack.c.bf16 %v1541_v48, %v1539_v24  ;;  %v1543_v50 = vpop.eup %1542 }
 0x30e   : > { %v914_v51 = vsel %vm790_vm4, %v892_v49, 0 }
 0x30f   : > { %v1545_v52 = vpop.eup %1544  ;;  %1410 = vmatpush3.bf16.xpose.msra.mxu0 %v914_v51  ;;  %1430 = vmatpush3.bf16.xpose.msra.mxu1 %v914_v51 }
 0x310   : > { %1411 = vmatprep.subr.bf16.mxu0 %v1608_v4  ;;  %1431 = vmatprep.subr.bf16.mxu1 %v1608_v4  ;;  %v893_v22 = vpack.c.bf16 %v1543_v50, %v1545_v52  ;;  %v1547_v53 = vpop.eup %1546 }
 0x312   : > { %v917_v57 = vsel %vm790_vm4, %v893_v22, 0 }
 0x313   : > { %v1549_v55 = vpop.eup %1548 }
 0x314   : > { %v894_v56 = vpack.c.bf16 %v1547_v53, %v1549_v55 }
 0x316   : > { %v920_v58 = vsel %vm790_vm4, %v894_v56, 0 }
 0x317   : > { %1412 = vmatpush3.bf16.xpose.msra.mxu0 %v917_v57  ;;  %1432 = vmatpush3.bf16.xpose.msra.mxu1 %v917_v57 }
 0x318   : > { %1413 = vmatprep.subr.bf16.mxu0 %v1608_v4  ;;  %1433 = vmatprep.subr.bf16.mxu1 %v1608_v4 }
 0x31f   : > { %1414 = vmatpush3.bf16.xpose.msra.mxu0 %v920_v58  ;;  %1434 = vmatpush3.bf16.xpose.msra.mxu1 %v920_v58 }
 0x326   : > { %1436 = vmatmul.mubr.msk.bf16.vlgmr.msra.gmra.mrb[24].mxu1 %vm790_vm4, %v1754_v54  ;;  %1416 = vmatmul.mubr.msk.bf16.vlgmr.msra.gmra.mrb[12].mxu0 %vm790_vm4, %v1610_v59 }
 0x327   : > { %1441 = vmatprep.mubr.msk.bf16.mxu0 %vm1017_vm5, %v1516_v60 }
 0x3f9   : > { %v999_v61 = vpop.f32.mrb[24].mxu1  ;;  %v956_v54 = vpop.f32.mrb[12].mxu0 }
 0x3fa   : > { %v1437_v62 = vpop.f32.mrb[25].mxu1  ;;  %v1417_v2 = vpop.f32.mrb[13].mxu0  ;;  %1550 = vrcp.f32 %v956_v54 }
 0x3fb   : > { %v1002_v63 = vpop.f32.mrb[26].mxu1  ;;  %v959_v3 = vpop.f32.mrb[14].mxu0 }
 0x3fc   : > { %v1006_v4 = vpack.c.bf16 %v1002_v63, %v999_v61  ;;  %v1438_v0 = vpop.f32.mrb[27].mxu1  ;;  %v1418_v5 = vpop.f32.mrb[15].mxu0 }
 0x3fe   : > { %1439 = vmatprep.subr.bf16.mxu0 %v1006_v4 }
 0x3ff   : > { %1440 = vmatpush3.bf16.msra.mxu0 %v1006_v4 }
 0x402   : > { %1442 = vmatmul.mubr.msk.bf16.vlgmr.msra.gmra.mrb[16].mxu0 %vm1017_vm5, %v1517_v1 }
 0x404   : > { %v1551_v14 = vpop.eup %1550 }
 0x405   : > { %v1077_v15 = vrot.slane %v1551_v14, %v1076_v12 }
 0x4d5   : > { %v1443_v16 = vpop.f32.mrb[16].mxu0 }
 0x4d6   : > { %v1080_v21 = vmul.f32 %v1443_v16, %v1077_v15  ;;  %v1058_v13 = vpop.f32.mrb[17].mxu0 }
 0x4d7   : > { %v1078_v23 = vmul.f32 %v1077_v15, %v1058_v13  ;;  %v1444_v27 = vpop.f32.mrb[18].mxu0  ;;  %1096 = sbr.rel (!%p1689_p6) target bundleno = 1254 (0x4e6), region = 82 }
 0x4d8   : > { %v1084_v28 = vadd.f32 %v1080_v21, %v1723_v8  ;;  %v1081_v29 = vmul.f32 %v1444_v27, %v1077_v15  ;;  %v1061_v18 = vpop.f32.mrb[19].mxu0 }
 0x4d9   : > { %v1082_v30 = vadd.f32 %v1078_v23, %v1719_v6  ;;  %v1079_v31 = vmul.f32 %v1077_v15, %v1061_v18 }
 0x4da   : > { %1088 = vst [vmem:[%s297_s7 + $0x10] sm:$0xff] %v1084_v28  ;;  %v1085_v32 = vadd.f32 %v1081_v29, %v1728_v10 }
 0x4db   : > { %1086 = vst [vmem:[%s297_s7] sm:$0xff] %v1082_v30  ;;  %v1083_v20 = vadd.f32 %v1079_v31, %v1721_v7 }
 0x4dc   : > { %1089 = vst [vmem:[%s297_s7 + $0x18] sm:$0xff] %v1085_v32 }
 0x4dd   : > { %1087 = vst [vmem:[%s297_s7 + $0x8] sm:$0xff] %v1083_v20 }
 0x4e1   : > { %v1138_v6 = vld [vmem:[%s297_s7 + $0x10] sm:$0xff] }
 0x4e2   : > { %v1134_v8 = vld [vmem:[%s297_s7] sm:$0xff]  ;;  %1139 = vst [vmem:[%s1100_s12 + $0x20] sm:$0xff] %v1138_v6 }
 0x4e3   : > { %v1140_v34 = vld [vmem:[%s297_s7 + $0x18] sm:$0xff]  ;;  %1135 = vst [vmem:[%s1100_s12] sm:$0xff] %v1134_v8 }
 0x4e4   : > { %v1136_v33 = vld [vmem:[%s297_s7 + $0x8] sm:$0xff]  ;;  %1141 = vst [vmem:[%s1100_s12 + $0x30] sm:$0xff] %v1140_v34 }
 0x4e5   : > { %1137 = vst [vmem:[%s1100_s12 + $0x10] sm:$0xff] %v1136_v33 }
 0x4e6 PF: > { %s15_s24 = sadd.s32 1, %s1606_s24   ;;  %s1894_s18 = smov %s1586_s19 }
 0x4e7   : > { %p12_p13 = scmp.ge.s32.totalorder %s15_s24, 6   ;;  %s1895_s19 = smov %s1697_s8 }
 0x4e8   : > { %s1896_s20 = smov %s1598_s22  ;;  %s1897_s21 = smov %s1602_s23 }
 0x4e9   : > { %s1898_s22 = smov %s1901_s25  ;;  %s1899_s23 = smov %s1905_s26 }
 0x4ea   :  { %14 = sbr.rel (!%p12_p13) target bundleno = 4 (0x4), region = 157 }

</bundles_post_ra>
